<compile_context>
chip_gen: v7x
topology: tpu7x:2x2x1
jax: 0.10.0
libtpu: 0.0.40
codegen_flags: <defaults>
</compile_context>

<pallas_src>
import jax
import jax.numpy as jnp
from jax import lax
from jax.experimental import pallas as pl
from jax.experimental.pallas import tpu as pltpu


def _down_kernel(x_ref, f0_ref, f1_ref, m0_ref, m1_ref, b_ref, o_ref):
    # x_ref : (1, C, 2*th, W)      input row-pairs for th output rows
    # f*_ref: (W, Wo)              0/1 column selection (even / odd input columns)
    # m*_ref: (out_c*th, C*2*th)   BN-folded conv weights x 0/1 row selection
    # b_ref : (out_c*th, 1)        BN-folded bias (per output channel, repeated th times)
    # o_ref : (1, out_c, th, Wo)   NCHW output tile (Wo on lanes)
    _, c, two_th, w_in = x_ref.shape
    x2 = x_ref[0].reshape(c * two_th, w_in)            # (C*2th, W), layout-trivial merge

    # stage 1: stride-2 column (kw) selection on the MXU; spatial stays on lanes.
    z0 = jnp.dot(x2, f0_ref[...])                      # (C*2th, Wo)  -> x[..., 2w+0]
    z1 = jnp.dot(x2, f1_ref[...])                      # (C*2th, Wo)  -> x[..., 2w+1]

    # stage 2: channel + kernel-row (kh) contraction with BN-scale-folded weights.
    acc = jnp.dot(m0_ref[...], z0, preferred_element_type=jnp.float32)
    acc = acc + jnp.dot(m1_ref[...], z1, preferred_element_type=jnp.float32)

    y = acc + b_ref[...]                               # folded BatchNorm (eval) bias
    y = jnp.where(y >= 0, y, 0.1 * y)                  # LeakyReLU(0.1)

    _, oc, th, wo = o_ref.shape
    o_ref[0] = y.reshape(oc, th, wo).astype(o_ref.dtype)


def down_forward(x, weight, gamma, beta, running_mean, running_var,
                 eps=1e-5, row_tile=8):
    """Fused Conv2d(k=2, s=2, no bias) + BatchNorm2d(eval) + LeakyReLU(0.1).

    x: (N, C, H, W); weight: (out_c, C, 2, 2). Returns (N, out_c, H//2, W//2).
    """
    N, C, H, W = x.shape
    out_c = weight.shape[0]
    assert H % 2 == 0 and W % 2 == 0, "k=2/s=2 conv expects even spatial dims"
    Ho, Wo = H // 2, W // 2

    # Output-row tile: th output rows consume 2*th contiguous input rows per grid step.
    # Multiples of 8 keep the in-kernel (C,2th,W)->(C*2th,W) and
    # (out_c*th,Wo)->(out_c,th,Wo) reshapes layout-trivial.
    row_tile = max(8, (int(row_tile) // 8) * 8)
    th = Ho if Ho <= row_tile else row_tile

    dt = x.dtype

    # Fold BatchNorm (eval-mode running statistics) into the conv weight / bias.
    # TODO(synk): training-mode BN (batch statistics) would need an extra
    # cross-(N,H,W) reduction pass; only eval-mode folding is implemented.
    inv = gamma / jnp.sqrt(running_var + eps)
    wf = (weight * inv[:, None, None, None]).astype(dt)        # (out_c, C, 2, 2)
    bias = (beta - running_mean * inv).astype(jnp.float32)

    # Stage-1 operands: 0/1 column-selection matrices (even / odd input columns).
    wcol = jnp.arange(Wo)
    f0 = jnp.zeros((W, Wo), dt).at[2 * wcol, wcol].set(1)
    f1 = jnp.zeros((W, Wo), dt).at[2 * wcol + 1, wcol].set(1)

    # Stage-2 operands: BN-folded conv weights combined with the 0/1 even/odd input-row
    # selection, so a single matmul does the channel + kernel-row contraction for all
    # th output rows of the tile.
    hrow = jnp.arange(th)
    p0 = jnp.zeros((th, 2 * th), dt).at[hrow, 2 * hrow].set(1)
    p1 = jnp.zeros((th, 2 * th), dt).at[hrow, 2 * hrow + 1].set(1)

    def make_m(kw):
        m = (jnp.einsum("oc,hr->ohcr", wf[:, :, 0, kw], p0)
             + jnp.einsum("oc,hr->ohcr", wf[:, :, 1, kw], p1))
        return m.reshape(out_c * th, C * 2 * th)

    m0, m1 = make_m(0), make_m(1)
    b = jnp.repeat(bias, th).reshape(out_c * th, 1)

    grid = (N, pl.cdiv(Ho, th))

    out = pl.pallas_call(
        _down_kernel,
        out_shape=jax.ShapeDtypeStruct((N, out_c, Ho, Wo), dt),
        grid=grid,
        in_specs=[
            pl.BlockSpec((1, C, 2 * th, W), lambda n, i: (n, 0, i, 0)),
            pl.BlockSpec((W, Wo), lambda n, i: (0, 0)),
            pl.BlockSpec((W, Wo), lambda n, i: (0, 0)),
            pl.BlockSpec((out_c * th, C * 2 * th), lambda n, i: (0, 0)),
            pl.BlockSpec((out_c * th, C * 2 * th), lambda n, i: (0, 0)),
            pl.BlockSpec((out_c * th, 1), lambda n, i: (0, 0)),
        ],
        out_specs=pl.BlockSpec((1, out_c, th, Wo), lambda n, i: (n, 0, i, 0)),
        compiler_params=pltpu.CompilerParams(
            dimension_semantics=("parallel", "parallel"),
            vmem_limit_bytes=64 * 1024 * 1024,
        ),
    )(x, f0, f1, m0, m1, b)
    return out


def _reference(x, weight, gamma, beta, running_mean, running_var, eps=1e-5):
    y = lax.conv_general_dilated(
        x, weight, window_strides=(2, 2), padding="VALID",
        dimension_numbers=("NCHW", "OIHW", "NCHW"))
    s = (gamma / jnp.sqrt(running_var + eps)).reshape(1, -1, 1, 1)
    b = (beta - running_mean * gamma / jnp.sqrt(running_var + eps)).reshape(1, -1, 1, 1)
    y = y * s + b
    return jnp.where(y >= 0, y, 0.1 * y)


if __name__ == "__main__":
    key = jax.random.PRNGKey(0)
    k1, k2, k3, k4, k5, k6 = jax.random.split(key, 6)

    N, in_c, H, W = 2, 4, 16, 16
    out_c = 8

    x = jax.random.normal(k1, (N, in_c, H, W), dtype=jnp.float32)
    weight = jax.random.normal(k2, (out_c, in_c, 2, 2), dtype=jnp.float32) * 0.1
    gamma = 1.0 + 0.1 * jax.random.normal(k3, (out_c,), dtype=jnp.float32)
    beta = 0.1 * jax.random.normal(k4, (out_c,), dtype=jnp.float32)
    running_mean = 0.1 * jax.random.normal(k5, (out_c,), dtype=jnp.float32)
    running_var = jnp.abs(1.0 + 0.1 * jax.random.normal(k6, (out_c,), dtype=jnp.float32))

    out = down_forward(x, weight, gamma, beta, running_mean, running_var)
    out = jax.block_until_ready(out)

    ref = _reference(x, weight, gamma, beta, running_mean, running_var)
    assert out.shape == (N, out_c, H // 2, W // 2)
    err = float(jnp.max(jnp.abs(out - ref)))
    assert jnp.allclose(out, ref, atol=1e-3, rtol=1e-3), err

    print("KERNEL_OK")
</pallas_src>

<mosaic_0001>
module attributes {stable_mosaic.version = 11 : i64} {
  func.func @_down_kernel(%arg0: i32, %arg1: i32, %arg2: memref<1x4x16x16xf32, #tpu.memory_space<vmem>>, %arg3: memref<16x8xf32, #tpu.memory_space<vmem>>, %arg4: memref<16x8xf32, #tpu.memory_space<vmem>>, %arg5: memref<64x64xf32, #tpu.memory_space<vmem>>, %arg6: memref<64x64xf32, #tpu.memory_space<vmem>>, %arg7: memref<64x1xf32, #tpu.memory_space<vmem>>, %arg8: memref<1x8x8x8xf32, #tpu.memory_space<vmem>>) attributes {dimension_semantics = [#tpu.dimension_semantics<parallel>, #tpu.dimension_semantics<parallel>], iteration_bounds = array<i64: 2, 1>, scalar_prefetch = 0 : i64, scratch_operands = 0 : i64, tpu.core_type = #tpu.core_type<tc>, window_params = [{transform_indices = @transform_0, window_bounds = array<i64: 1, 4, 16, 16>}, {pipeline_mode = #tpu.pipeline_mode<synchronous>, transform_indices = @transform_1, window_bounds = array<i64: 16, 8>}, {pipeline_mode = #tpu.pipeline_mode<synchronous>, transform_indices = @transform_2, window_bounds = array<i64: 16, 8>}, {pipeline_mode = #tpu.pipeline_mode<synchronous>, transform_indices = @transform_3, window_bounds = array<i64: 64, 64>}, {pipeline_mode = #tpu.pipeline_mode<synchronous>, transform_indices = @transform_4, window_bounds = array<i64: 64, 64>}, {pipeline_mode = #tpu.pipeline_mode<synchronous>, transform_indices = @transform_5, window_bounds = array<i64: 64, 1>}, {transform_indices = @transform_6, window_bounds = array<i64: 1, 8, 8, 8>}]} {
    %c0 = arith.constant 0 : index
    %c0_0 = arith.constant 0 : index
    %c0_1 = arith.constant 0 : index
    %c0_2 = arith.constant 0 : index
    %0 = vector.load %arg2[%c0, %c0_0, %c0_1, %c0_2] : memref<1x4x16x16xf32, #tpu.memory_space<vmem>>, vector<1x4x16x16xf32>
    %1 = vector.shape_cast %0 : vector<1x4x16x16xf32> to vector<4x16x16xf32>
    %2 = vector.shape_cast %1 : vector<4x16x16xf32> to vector<64x16xf32>
    %c0_3 = arith.constant 0 : index
    %c0_4 = arith.constant 0 : index
    %3 = vector.load %arg3[%c0_3, %c0_4] : memref<16x8xf32, #tpu.memory_space<vmem>>, vector<16x8xf32>
    %cst = arith.constant dense<0.000000e+00> : vector<64x8xf32>
    %4 = tpu.matmul %2, %3, %cst {dimension_numbers = #tpu.dot_dimension_numbers<[1], [0], [0], [1], [0, 0, 1, 1], [], []>} : vector<64x16xf32>, vector<16x8xf32>, vector<64x8xf32> -> vector<64x8xf32>
    %c0_5 = arith.constant 0 : index
    %c0_6 = arith.constant 0 : index
    %5 = vector.load %arg4[%c0_5, %c0_6] : memref<16x8xf32, #tpu.memory_space<vmem>>, vector<16x8xf32>
    %cst_7 = arith.constant dense<0.000000e+00> : vector<64x8xf32>
    %6 = tpu.matmul %2, %5, %cst_7 {dimension_numbers = #tpu.dot_dimension_numbers<[1], [0], [0], [1], [0, 0, 1, 1], [], []>} : vector<64x16xf32>, vector<16x8xf32>, vector<64x8xf32> -> vector<64x8xf32>
    %c0_8 = arith.constant 0 : index
    %c0_9 = arith.constant 0 : index
    %7 = vector.load %arg5[%c0_8, %c0_9] : memref<64x64xf32, #tpu.memory_space<vmem>>, vector<64x64xf32>
    %cst_10 = arith.constant dense<0.000000e+00> : vector<64x8xf32>
    %8 = tpu.matmul %7, %4, %cst_10 {dimension_numbers = #tpu.dot_dimension_numbers<[1], [0], [0], [1], [0, 0, 1, 1], [], []>} : vector<64x64xf32>, vector<64x8xf32>, vector<64x8xf32> -> vector<64x8xf32>
    %c0_11 = arith.constant 0 : index
    %c0_12 = arith.constant 0 : index
    %9 = vector.load %arg6[%c0_11, %c0_12] : memref<64x64xf32, #tpu.memory_space<vmem>>, vector<64x64xf32>
    %cst_13 = arith.constant dense<0.000000e+00> : vector<64x8xf32>
    %10 = tpu.matmul %9, %6, %cst_13 {dimension_numbers = #tpu.dot_dimension_numbers<[1], [0], [0], [1], [0, 0, 1, 1], [], []>} : vector<64x64xf32>, vector<64x8xf32>, vector<64x8xf32> -> vector<64x8xf32>
    %11 = arith.addf %8, %10 : vector<64x8xf32>
    %c0_14 = arith.constant 0 : index
    %c0_15 = arith.constant 0 : index
    %12 = vector.load %arg7[%c0_14, %c0_15] : memref<64x1xf32, #tpu.memory_space<vmem>>, vector<64x1xf32>
    %13 = vector.broadcast %12 : vector<64x1xf32> to vector<64x8xf32>
    %14 = arith.addf %11, %13 : vector<64x8xf32>
    %cst_16 = arith.constant 0.000000e+00 : f32
    %15 = vector.broadcast %cst_16 : f32 to vector<64x8xf32>
    %16 = arith.cmpf oge, %14, %15 : vector<64x8xf32>
    %cst_17 = arith.constant 1.000000e-01 : f32
    %17 = vector.broadcast %cst_17 : f32 to vector<64x8xf32>
    %18 = arith.mulf %17, %14 : vector<64x8xf32>
    %19 = arith.select %16, %14, %18 : vector<64x8xi1>, vector<64x8xf32>
    %20 = vector.shape_cast %19 : vector<64x8xf32> to vector<8x8x8xf32>
    %c0_18 = arith.constant 0 : index
    %c0_19 = arith.constant 0 : index
    %c0_20 = arith.constant 0 : index
    %c0_21 = arith.constant 0 : index
    %21 = vector.load %arg8[%c0_18, %c0_19, %c0_20, %c0_21] : memref<1x8x8x8xf32, #tpu.memory_space<vmem>>, vector<1x8x8x8xf32>
    %22 = vector.shape_cast %21 : vector<1x8x8x8xf32> to vector<8x8x8xf32>
    %23 = vector.shape_cast %20 : vector<8x8x8xf32> to vector<1x8x8x8xf32>
    tpu.vector_store %arg8[%c0_18, %c0_19, %c0_20, %c0_21], %23 {strides = array<i32>} : memref<1x8x8x8xf32, #tpu.memory_space<vmem>>, vector<1x8x8x8xf32>,
    return
  }
  func.func @transform_0(%arg0: i32, %arg1: i32) -> (i32, i32, i32, i32) {
    %c0_i32 = arith.constant 0 : i32
    %c0_i32_0 = arith.constant 0 : i32
    %c0_i32_1 = arith.constant 0 : i32
    return %arg0, %c0_i32, %arg1, %c0_i32_0 : i32, i32, i32, i32
  }
  func.func @transform_1(%arg0: i32, %arg1: i32) -> (i32, i32) {
    %c0_i32 = arith.constant 0 : i32
    %c0_i32_0 = arith.constant 0 : i32
    %c0_i32_1 = arith.constant 0 : i32
    return %c0_i32, %c0_i32_0 : i32, i32
  }
  func.func @transform_2(%arg0: i32, %arg1: i32) -> (i32, i32) {
    %c0_i32 = arith.constant 0 : i32
    %c0_i32_0 = arith.constant 0 : i32
    %c0_i32_1 = arith.constant 0 : i32
    return %c0_i32, %c0_i32_0 : i32, i32
  }
  func.func @transform_3(%arg0: i32, %arg1: i32) -> (i32, i32) {
    %c0_i32 = arith.constant 0 : i32
    %c0_i32_0 = arith.constant 0 : i32
    %c0_i32_1 = arith.constant 0 : i32
    return %c0_i32, %c0_i32_0 : i32, i32
  }
  func.func @transform_4(%arg0: i32, %arg1: i32) -> (i32, i32) {
    %c0_i32 = arith.constant 0 : i32
    %c0_i32_0 = arith.constant 0 : i32
    %c0_i32_1 = arith.constant 0 : i32
    return %c0_i32, %c0_i32_0 : i32, i32
  }
  func.func @transform_5(%arg0: i32, %arg1: i32) -> (i32, i32) {
    %c0_i32 = arith.constant 0 : i32
    %c0_i32_0 = arith.constant 0 : i32
    %c0_i32_1 = arith.constant 0 : i32
    return %c0_i32, %c0_i32_0 : i32, i32
  }
  func.func @transform_6(%arg0: i32, %arg1: i32) -> (i32, i32, i32, i32) {
    %c0_i32 = arith.constant 0 : i32
    %c0_i32_0 = arith.constant 0 : i32
    %c0_i32_1 = arith.constant 0 : i32
    return %arg0, %c0_i32, %arg1, %c0_i32_0 : i32, i32, i32, i32
  }
}

</mosaic_0001>

<bundles_post_ra>
// kernel: tpu_custom_call.1
= control target key start
LH: loop header
LB: loop body
LE: loop exit
PB: predicated region body
PF: predicated region fallthrough
CT: control target
= control target key end

     0   :  { %s2207_s0 = inlined_call_operand.hbm [shape: f32[2,4,16,16], index: 0, kind: input, shape index: {}]   ;;  %s2208_s1 = inlined_call_operand.hbm [shape: f32[16,8], index: 1, kind: input, shape index: {}]   ;;  %s2209_s2 = inlined_call_operand.hbm [shape: f32[16,8], index: 2, kind: input, shape index: {}]   ;;  %s2210_s3 = inlined_call_operand.hbm [shape: f32[64,64], index: 3, kind: input, shape index: {}]   ;;  %s2211_s4 = inlined_call_operand.hbm [shape: f32[64,64], index: 4, kind: input, shape index: {}]   ;;  %s2212_s5 = inlined_call_operand.hbm [shape: f32[64,1], index: 5, kind: input, shape index: {}]   ;;  %s2213_s6 = inlined_call_operand.hbm [shape: f32[2,8,8,8], index: 6, kind: output, shape index: {}]  }
   0x1   :  { %2220 = sst [smem:[#allocation19_spill]] %s2208_s1 }
   0x2   :  { %11 = vsyncpa [#allocation3], 0 }
   0x3   :  { %13 = vsyncpa [#allocation3 + $0x1], 0 }
   0x4   :  { %14 = vsyncpa [#allocation6], 0 }
   0x5   :  { %15 = vsyncpa [#allocation9], 0 }
   0x6   :  { %16 = vsyncpa [#allocation12], 0 }
   0x7   :  { %17 = vsyncpa [#allocation4], 0 }
   0x8   :  { %19 = vsyncpa [#allocation4 + $0x1], 0  ;;  %s1802_s21 = smov 0   ;;  %s1804_s22 = smov 0  }
   0x9   :  { %s1806_s23 = smov 0   ;;  %s1808_s24 = smov 0  }
   0xa   :  { %s1810_s25 = smov 0   ;;  %s1812_s26 = smov 0  }
   0xb LB: > { %s2214_s27 = sadd.s32 4294967295, %s1753_s26   ;;  %p1124_p0 = scmp.ge.s32.totalorder %s1753_s26, 1  ;;  %s1753_s26 = sphi %s1812_s26, %s25_s26   ;;  %s1749_s25 = sphi %s1810_s25, %s2243_s25   ;;  %s1745_s24 = sphi %s1808_s24, %s2242_s24   ;;  %s1741_s23 = sphi %s1806_s23, %s2241_s23   ;;  %s1737_s22 = sphi %s1804_s22, %s2240_s22   ;;  %s1733_s21 = sphi %s1802_s21, %s2239_s21  }
   0xc   : > { %p1836_p1 = scmp.eq.s32.totalorder %s2214_s27, 0  ;;  %p203_p2 = scmp.lt.s32.totalorder %s1753_s26, 3 }
   0xd   : > { %s1755_s30 = smov [#allocation5]   ;;  %s1756_s9 = smov [#allocation8]  }
   0xe   : > { %s2221_s28 = scalar_select %p1836_p1, 1, 0 }
   0xf   : > { %p1841_p3 = pnand %p1124_p0, %p203_p2  ;;  %s215_s7 = sshll.u32 %s1755_s30, 4  ;;  %s1845_s7 = int_to_ptr.vmem [resolvable:$true] %s215_s7 }
  0x10   : > { %s241_s10 = sshll.u32 %s1756_s9, 4  ;;  %s1757_s11 = smov [#allocation7]   ;;  %s1856_s10 = int_to_ptr.vmem [resolvable:$true] %s241_s10 }
  0x11   : > { %s2222_s29 = scalar_select %p1841_p3, 1, 0 }
  0x12   : > { %p1393_p4 = pneg %p1841_p3  ;;  %s1858_s12 = sshll.u32 %s1757_s11, 4  ;;  %s229_s12 = int_to_ptr.vmem [resolvable:$true] %s1858_s12 }
  0x13   : > { %s2224_s1 = sld [smem:[#allocation19_spill]] }
  0x14   : > { %p1852_p6 = pnand %p1393_p4, %p1836_p1 }
  0x16   : > { %p1868_p8 = pneg %p1852_p6 }
  0x19   : > { %s1489_s15 = scalar_lea.hbm %s2224_s1, 256 }
  0x1a   : > { %p1490_p7 = scmp.ne.s32.totalorder %s2224_s1, %s1489_s15  ;;  %p1496_p11 = scmp.lt.u32.totalorder %s1489_s15, %s2224_s1 }
  0x1c   : > { %p1492_p9 = pnand %p1868_p8, %p1490_p7 }
  0x1e   : > { %p1493_p10 = pneg %p1492_p9 }
  0x20   : > { %p1498_p12 = pnand %p1496_p11, %p1493_p10 }
  0x22   : > { %1501 = shalt.err (!%p1498_p12)
}
  0x23   : > { %s1502_s30 = scalar_lea.vmem %s1845_s7, 256  ;;  %p1510_p4 = scmp.lt.s32.totalorder %s1845_s7, %s1845_s7 }
  0x24   : > { %p1503_p13 = scmp.ne.s32.totalorder %s1845_s7, %s1502_s30  ;;  %p1511_p5 = scmp.lt.s32.totalorder %s1502_s30, %s1502_s30 }
  0x26   : > { %p1505_p0 = pnand %p1503_p13, %p1868_p8  ;;  %p1512_p7 = por %p1511_p5, %p1510_p4 }
  0x28   : > { %p1506_p2 = pneg %p1505_p0 }
  0x2a   : > { %p1513_p9 = pnand %p1512_p7, %p1506_p2 }
  0x2c   : > { %1516 = shalt.err (!%p1513_p9)
}
  0x2d   : > { %s2218_s9 = smov 128   ;;  %s1759_s11 = smov 8  }
  0x2e   : > { %1396 = dma.hbm_to_vmem [thread:$0]  (!%p1852_p6), %s2224_s1, 256, %s1845_s7, [#allocation6], %s2218_s9, %s2218_s9, %s1759_s11  }
  0x2f   : > { %s1517_s17 = scalar_lea.hbm %s2210_s3, 1024 }
  0x30   : > { %p1518_p5 = scmp.ne.s32.totalorder %s2210_s3, %s1517_s17  ;;  %p1524_p12 = scmp.lt.u32.totalorder %s1517_s17, %s2210_s3 }
  0x32   : > { %p1520_p10 = pnand %p1518_p5, %p1868_p8 }
  0x34   : > { %p1521_p11 = pneg %p1520_p10 }
  0x36   : > { %p1526_p13 = pnand %p1524_p12, %p1521_p11 }
  0x38   : > { %1529 = shalt.err (!%p1526_p13)
}
  0x39   : > { %s1530_s7 = scalar_lea.vmem %s1856_s10, 1024  ;;  %p1538_p7 = scmp.lt.s32.totalorder %s1856_s10, %s1856_s10 }
  0x3a   : > { %p1531_p0 = scmp.ne.s32.totalorder %s1856_s10, %s1530_s7  ;;  %p1539_p9 = scmp.lt.s32.totalorder %s1530_s7, %s1530_s7 }
  0x3c   : > { %p1533_p2 = pnand %p1531_p0, %p1868_p8  ;;  %p1540_p5 = por %p1539_p9, %p1538_p7 }
  0x3e   : > { %p1534_p4 = pneg %p1533_p2 }
  0x40   : > { %p1541_p10 = pnand %p1540_p5, %p1534_p4 }
  0x42   : > { %1544 = shalt.err (!%p1541_p10)
}
  0x43   : > { %1402 = dma.hbm_to_vmem [thread:$0]  (!%p1852_p6), %s2210_s3, 1024, %s1856_s10, [#allocation9], %s2218_s9, %s2218_s9, %s1759_s11  }
  0x44   : > { %s1545_s16 = scalar_lea.hbm %s2209_s2, 256 }
  0x45   : > { %p1546_p11 = scmp.ne.s32.totalorder %s2209_s2, %s1545_s16  ;;  %p1552_p0 = scmp.lt.u32.totalorder %s1545_s16, %s2209_s2 }
  0x47   : > { %p1548_p12 = pnand %p1546_p11, %p1868_p8 }
  0x49   : > { %p1549_p13 = pneg %p1548_p12 }
  0x4b   : > { %p1554_p2 = pnand %p1552_p0, %p1549_p13 }
  0x4d   : > { %1557 = shalt.err (!%p1554_p2)
}
  0x4e   : > { %s1558_s7 = scalar_lea.vmem %s229_s12, 256  ;;  %p1566_p5 = scmp.lt.s32.totalorder %s229_s12, %s229_s12 }
  0x4f   : > { %p1559_p4 = scmp.ne.s32.totalorder %s229_s12, %s1558_s7  ;;  %p1567_p10 = scmp.lt.s32.totalorder %s1558_s7, %s1558_s7 }
  0x51   : > { %p1561_p7 = pnand %p1559_p4, %p1868_p8  ;;  %p1568_p3 = por %p1567_p10, %p1566_p5 }
  0x53   : > { %p1562_p9 = pneg %p1561_p7 }
  0x55   : > { %p1569_p1 = pnand %p1568_p3, %p1562_p9 }
  0x57   : > { %1572 = shalt.err (!%p1569_p1)
}
  0x58   : > { %1399 = dma.hbm_to_vmem [thread:$0]  (!%p1852_p6), %s2209_s2, 256, %s229_s12, [#allocation6], %s2218_s9, %s2218_s9, %s1759_s11  }
  0x59   : > { %s1760_s13 = smov [#allocation10]   ;;  %s1761_s15 = smov [#allocation11]  }
  0x5a   : > { %s254_s14 = sshll.u32 %s1760_s13, 4  ;;  %s267_s16 = sshll.u32 %s1761_s15, 4  ;;  %s255_s14 = int_to_ptr.vmem [resolvable:$true] %s254_s14  ;;  %s268_s16 = int_to_ptr.vmem [resolvable:$true] %s267_s16 }
  0x5b   : > { %s1573_s20 = scalar_lea.hbm %s2211_s4, 1024 }
  0x5c   : > { %p1574_p1 = scmp.ne.s32.totalorder %s2211_s4, %s1573_s20  ;;  %p1580_p12 = scmp.lt.u32.totalorder %s1573_s20, %s2211_s4 }
  0x5e   : > { %p1576_p3 = pnand %p1574_p1, %p1868_p8 }
  0x60   : > { %p1577_p11 = pneg %p1576_p3 }
  0x62   : > { %p1582_p13 = pnand %p1580_p12, %p1577_p11 }
  0x64   : > { %1585 = shalt.err (!%p1582_p13)
}
  0x65   : > { %s1586_s12 = scalar_lea.vmem %s255_s14, 1024  ;;  %p1594_p7 = scmp.lt.s32.totalorder %s255_s14, %s255_s14 }
  0x66   : > { %p1587_p0 = scmp.ne.s32.totalorder %s255_s14, %s1586_s12  ;;  %p1595_p9 = scmp.lt.s32.totalorder %s1586_s12, %s1586_s12 }
  0x68   : > { %p1589_p2 = pnand %p1587_p0, %p1868_p8  ;;  %p1596_p5 = por %p1595_p9, %p1594_p7 }
  0x6a   : > { %p1590_p4 = pneg %p1589_p2 }
  0x6c   : > { %p1597_p10 = pnand %p1596_p5, %p1590_p4 }
  0x6e   : > { %1600 = shalt.err (!%p1597_p10)
}
  0x6f   : > { %1405 = dma.hbm_to_vmem [thread:$0]  (!%p1852_p6), %s2211_s4, 1024, %s255_s14, [#allocation9], %s2218_s9, %s2218_s9, %s1759_s11  }
  0x70   : > { %s1601_s17 = scalar_lea.hbm %s2212_s5, 1024 }
  0x71   : > { %p1602_p1 = scmp.ne.s32.totalorder %s2212_s5, %s1601_s17  ;;  %p1608_p12 = scmp.lt.u32.totalorder %s1601_s17, %s2212_s5 }
  0x73   : > { %p1604_p3 = pnand %p1602_p1, %p1868_p8 }
  0x75   : > { %p1605_p11 = pneg %p1604_p3 }
  0x77   : > { %p1610_p13 = pnand %p1608_p12, %p1605_p11 }
  0x79   : > { %1613 = shalt.err (!%p1610_p13)
}
  0x7a   : > { %s1614_s10 = scalar_lea.vmem %s268_s16, 1024  ;;  %p1622_p7 = scmp.lt.s32.totalorder %s268_s16, %s268_s16 }
  0x7b   : > { %p1615_p0 = scmp.ne.s32.totalorder %s268_s16, %s1614_s10  ;;  %p1623_p9 = scmp.lt.s32.totalorder %s1614_s10, %s1614_s10 }
  0x7d   : > { %p1617_p2 = pnand %p1615_p0, %p1868_p8  ;;  %p1624_p5 = por %p1623_p9, %p1622_p7 }
  0x7f   : > { %p1618_p4 = pneg %p1617_p2 }
  0x81   : > { %p1625_p10 = pnand %p1624_p5, %p1618_p4 }
  0x83   : > { %1628 = shalt.err (!%p1625_p10)
}
  0x84   : > { %1408 = dma.hbm_to_vmem [thread:$0]  (!%p1852_p6), %s2212_s5, 1024, %s268_s16, [#allocation12], %s2218_s9, %s2218_s9, %s1759_s11  }
  0x85   : > { %s1123_s8 = sadd.s32 4294967294, %s1753_s26   ;;  %s37_s18 = sadd.s32 1, %s1749_s25 }
  0x86   : > { %s46_s1 = sadd.s32 1, %s1741_s23  ;;  %p39_p8 = scmp.ge.s32.totalorder %s37_s18, 2 }
  0x87   : > { %p53_p1 = scmp.ne.s32.totalorder %s1741_s23, %s1737_s22  ;;  %p54_p3 = scmp.eq.s32.totalorder %s1753_s26, 0 }
  0x88   : > { %p59_p11 = scmp.ne.s32.totalorder %s1737_s22, %s1733_s21  ;;  %s2245_s18 = smov (%p39_p8, %s37_s18), 0 }
  0x89   : > { %p1992_p12 = por %p54_p3, %p53_p1  ;;  %p2227_p13 = scmp.ne.s32.totalorder %s2221_s28, 0 }
  0x8a   : > { %s41_s13 = ssub.s32 %s1749_s25, %s2245_s18  ;;  %s2229_s15 = sadd.s32 4294967295, %s1753_s26  }
  0x8b   : > { %p1998_p6 = por %p2227_p13, %p59_p11  ;;  %p190_p0 = scmp.eq.s32.totalorder %s2229_s15, 1 }
  0x8c   : > { %p44_p2 = scmp.eq.s32.totalorder %s41_s13, 0  ;;  %p196_p4 = scmp.eq.s32.totalorder %s1123_s8, 1 }
  0x8d   : > { %p2006_p7 = por %p190_p0, %p53_p1  ;;  %p1422_p9 = scmp.lt.s32.totalorder %s1753_s26, 2 }
  0x8e   : > { %s2012_s19 = scalar_select %p44_p2, %s1741_s23, %s46_s1  }
  0x8f   : > { %s2230_s17 = scalar_select %p2006_p7, 1, 0 }
  0x90   : > { %p2014_p5 = por %p196_p4, %p59_p11  ;;  %s281_s30 = sand.u32 1, %s1741_s23  }
  0x91   : > { %s1131_s7 = sshll.u32 %s281_s30, 6  ;;  %s1179_s10 = sshll.u32 %s1749_s25, 10 }
  0x92   : > { %s2231_s20 = scalar_select %p2014_p5, 1, 0 }
  0x93   : > { %s2023_s15 = scalar_lea.hbm %s2207_s0, %s1179_s10  ;;  %s285_s8 = scalar_lea.vmem [#allocation2], %s1131_s7 }
  0x94   : > { %s294_s13 = sshll.u32 %s285_s8, 4  ;;  %p2029_p10 = pnand %p1422_p9, %p1992_p12  ;;  %s2025_s13 = int_to_ptr.vmem [resolvable:$true] %s294_s13 }
  0x95   : > { %s2033_s9 = scalar_lea.sflag [#allocation3], %s281_s30  ;;  %s1629_s14 = scalar_lea.hbm %s2023_s15, 1024 }
  0x96   : > { %p1630_p8 = scmp.ne.s32.totalorder %s2023_s15, %s1629_s14  ;;  %p1631_p1 = pneg %p2029_p10 }
  0x97   : > { %s1634_s27 = scalar_lea.hbm %s2207_s0, 2048  ;;  %p1635_p12 = scmp.lt.u32.totalorder %s2023_s15, %s2207_s0 }
  0x98   : > { %p1632_p3 = pnand %p1631_p1, %p1630_p8  ;;  %p1636_p13 = scmp.lt.u32.totalorder %s1634_s27, %s1629_s14 }
  0x99   : > { %p1638_p2 = scmp.lt.u32.totalorder %s1629_s14, %s2023_s15 }
  0x9a   : > { %p1633_p11 = pneg %p1632_p3  ;;  %p1637_p0 = por %p1636_p13, %p1635_p12 }
  0x9c   : > { %p1639_p4 = por %p1638_p2, %p1637_p0 }
  0x9e   : > { %p1640_p9 = pnand %p1639_p4, %p1633_p11 }
  0xa0   : > { %1643 = shalt.err (!%p1640_p9)
}
  0xa1   : > { %s1644_s30 = scalar_lea.vmem %s2025_s13, 1024  ;;  %s1762_s7 = smov [#allocation2]  }
  0xa2   : > { %p1645_p8 = scmp.ne.s32.totalorder %s2025_s13, %s1644_s30  ;;  %s1649_s10 = sshll.u32 %s1762_s7, 4  ;;  %s1650_s10 = int_to_ptr.vmem [resolvable:$false] %s1649_s10 }
  0xa3   : > { %s1651_s12 = scalar_lea.vmem %s1650_s10, 2048  ;;  %p1652_p7 = scmp.lt.s32.totalorder %s2025_s13, %s1650_s10 }
  0xa4   : > { %p1647_p3 = pnand %p1645_p8, %p1631_p1  ;;  %p1653_p12 = scmp.lt.s32.totalorder %s1651_s12, %s1644_s30 }
  0xa6   : > { %p1648_p5 = pneg %p1647_p3  ;;  %p1654_p13 = por %p1653_p12, %p1652_p7 }
  0xa8   : > { %p1655_p0 = pnand %p1654_p13, %p1648_p5 }
  0xaa   : > { %1658 = shalt.err (!%p1655_p0)
}
  0xab   : > { %s2233_s14 = smov 128   ;;  %p2234_p1 = scmp.ne.s32.totalorder %s2222_s29, 0 }
  0xac   : > { %1412 = dma.hbm_to_vmem [thread:$0]  (!%p2029_p10), %s2023_s15, 1024, %s2025_s13, %s2033_s9, %s2233_s14, %s2233_s14, %s1759_s11  }
  0xad   : > { %306 = sbr.rel (%p2234_p1) target bundleno = 674 (0x2a2), region = 44  ;;  %s2067_s27 = sand.u32 (!%p2234_p1), 1, %s1737_s22  }
  0xae   : > { %s1135_s8 = sshll.u32 (!%p2234_p1), %s2067_s27, 6  ;;  %s309_s30 = scalar_lea.sflag (!%p2234_p1), [#allocation3], %s2067_s27 }
  0xaf   : > { %s2073_s1 = scalar_lea.vmem (!%p2234_p1), [#allocation2], %s1135_s8 }
  0xb4   : > { %1712 = dma.done.wait (%p1998_p6), %s309_s30, 1024  }
  0xb5   : > { %1714 = vsyncadd (%p1998_p6), %s309_s30, 4294966272  ;;  %p2235_p7 = scmp.ne.s32.totalorder %s2221_s28, 0 }
  0xb7   : > { %1716 = dma.done.wait (%p2235_p7), [#allocation6], 512  }
  0xb8   : > { %1718 = vsyncadd (%p2235_p7), [#allocation6], 4294966784 }
  0xb9   : > { %1720 = dma.done.wait (%p2235_p7), [#allocation9], 2048  }
  0xba   : > { %1722 = vsyncadd (%p2235_p7), [#allocation9], 4294965248 }
  0xbb   : > { %1724 = dma.done.wait (%p2235_p7), [#allocation12], 1024  }
  0xbc   : > { %1726 = vsyncadd (%p2235_p7), [#allocation12], 4294966272  ;;  %vm372_vm0 = vcmask 130048   ;;  %v370_v0 = vld [vmem:[#allocation5] sm:$0xff]  ;;  %v371_v1 = vld [vmem:[#allocation5 + $0x8] sm:$0xff]  ;;  %vm625_vm1 = vcmask 523264  }
  0xbd   : > { %v502_v2 = vld [vmem:[#allocation7] sm:$0xff]  ;;  %v1321_v3 = vpack.c.bf16 %v371_v1, %v370_v0  ;;  %v503_v4 = vld [vmem:[#allocation7 + $0x8] sm:$0xff]  ;;  %v362_v5 = vld [vmem:[%s2073_s1] sm:$0xff]  ;;  %v1763_v18 = vmov 0   ;;  %vm964_vm3 = vcmask 64512   ;;  %s2133_s28 = scalar_lea.vmem [#allocation13], %s1135_s8 }
  0xbe   : > { %v1325_v6 = vpack.c.bf16 %v503_v4, %v502_v2  ;;  %1237 = vmatprep.mubr.msk.f32.mxu0 %vm372_vm0, %v362_v5  ;;  %1253 = vmatprep.mubr.msk.f32.mxu1 %vm372_vm0, %v362_v5  ;;  %v363_v7 = vld [vmem:[%s2073_s1 + $0x8] sm:$0xff]  ;;  %v364_v8 = vld [vmem:[%s2073_s1 + $0x10] sm:$0xff]  ;;  %v365_v9 = vld [vmem:[%s2073_s1 + $0x18] sm:$0xff]  ;;  %s1180_s29 = sshll.u32 %s1745_s24, 10  ;;  %s988_s9 = sshll.u32 %s2133_s28, 4  ;;  %s2154_s9 = int_to_ptr.vmem [resolvable:$true] %s988_s9 }
  0xbf   : > { %1322 = vmatprep.subr.bf16.mxu0 %v1321_v3  ;;  %v366_v10 = vld [vmem:[%s2073_s1 + $0x20] sm:$0xff]  ;;  %v367_v11 = vld [vmem:[%s2073_s1 + $0x28] sm:$0xff]  ;;  %v368_v12 = vld [vmem:[%s2073_s1 + $0x30] sm:$0xff]  ;;  %1488 = vset.pattern.permute.xlu1 %v1763_v18  ;;  %s2152_s15 = scalar_lea.hbm %s2213_s6, %s1180_s29  ;;  %s974_s24 = scalar_lea.sflag [#allocation4], %s2067_s27 }
  0xc0   : > { %1326 = vmatprep.subr.bf16.mxu1 %v1325_v6  ;;  %1324 = vmatpush3.bf16.msra.mxu0 %v1321_v3  ;;  %v369_v13 = vld [vmem:[%s2073_s1 + $0x38] sm:$0xff]  ;;  %v617_v14 = vld [vmem:[#allocation10] sm:$0xff]  ;;  %v886_v16 = vld [vmem:[#allocation11 + $0x10] sm:$0xff]  ;;  %s1659_s13 = scalar_lea.vmem %s2154_s9, 1024  ;;  %p2236_p5 = scmp.ne.s32.totalorder %s2230_s17, 0 }
  0xc1   : > { %1328 = vmatpush3.bf16.msra.mxu1 %v1325_v6  ;;  %v609_v15 = vld [vmem:[#allocation8] sm:$0xff]  ;;  %1487 = vset.pattern.permute.xlu0 %v1763_v18  ;;  %v887_v19 = vld [vmem:[#allocation11 + $0x18] sm:$0xff]  ;;  %v885_v20 = vld [vmem:[#allocation11 + $0x8] sm:$0xff]  ;;  %p1660_p6 = scmp.ne.s32.totalorder %s2154_s9, %s1659_s13  ;;  %s1764_s7 = smov [#allocation13]  }
  0xc2   : > { %v884_v17 = vld [vmem:[#allocation11] sm:$0xff]  ;;  %904 = vperm.xlu1 %1488, %v886_v16   ;;  %v889_v21 = vld [vmem:[#allocation11 + $0x28] sm:$0xff]  ;;  %v891_v23 = vld [vmem:[#allocation11 + $0x38] sm:$0xff]  ;;  %s1663_s10 = sshll.u32 %s1764_s7, 4  ;;  %s1664_s10 = int_to_ptr.vmem [resolvable:$false] %s1663_s10 }
  0xc3   : > { %1238 = vmatmul.mubr.msk.f32.vlgmr.msra.gmra.mrb[0].mxu0 %vm372_vm0, %v363_v7  ;;  %894 = vperm.xlu0 %1487, %v884_v17   ;;  %v888_v22 = vld [vmem:[#allocation11 + $0x20] sm:$0xff]  ;;  %v890_v24 = vld [vmem:[#allocation11 + $0x30] sm:$0xff]  ;;  %v610_v49 = vld [vmem:[#allocation8 + $0x8] sm:$0xff]  ;;  %p1661_p10 = pnand %p1660_p6, %p2236_p5  ;;  %s1665_s12 = scalar_lea.vmem %s1664_s10, 2048 }
  0xc4   : > { %1254 = vmatmul.mubr.msk.f32.vlgmr.msra.gmra.mrb[0].mxu1 %vm372_vm0, %v363_v7  ;;  %1240 = vmatprep.mubr.msk.f32.mxu0 %vm372_vm0, %v364_v8  ;;  %v618_v50 = vld [vmem:[#allocation10 + $0x8] sm:$0xff]  ;;  %v611_v51 = vld [vmem:[#allocation8 + $0x10] sm:$0xff]  ;;  %v612_v53 = vld [vmem:[#allocation8 + $0x18] sm:$0xff]  ;;  %p1666_p2 = scmp.lt.s32.totalorder %s2154_s9, %s1664_s10  ;;  %p1667_p4 = scmp.lt.s32.totalorder %s1665_s12, %s1659_s13 }
  0xc5   : > { %1256 = vmatprep.mubr.msk.f32.mxu1 %vm372_vm0, %v364_v8  ;;  %v619_v52 = vld [vmem:[#allocation10 + $0x10] sm:$0xff]  ;;  %v620_v54 = vld [vmem:[#allocation10 + $0x18] sm:$0xff]  ;;  %v613_v55 = vld [vmem:[#allocation8 + $0x20] sm:$0xff]  ;;  %p1662_p11 = pneg %p1661_p10 }
  0xc6   : > { %909 = vperm.xlu1 %1488, %v887_v19   ;;  %v621_v56 = vld [vmem:[#allocation10 + $0x20] sm:$0xff]  ;;  %v614_v57 = vld [vmem:[#allocation8 + $0x28] sm:$0xff]  ;;  %v615_v59 = vld [vmem:[#allocation8 + $0x30] sm:$0xff]  ;;  %p1668_p9 = por %p1667_p4, %p1666_p2 }
  0xc7   : > { %1241 = vmatmul.mubr.msk.f32.gmra.mrb[2].mxu0 %vm372_vm0, %v365_v9  ;;  %899 = vperm.xlu0 %1487, %v885_v20   ;;  %v622_v58 = vld [vmem:[#allocation10 + $0x28] sm:$0xff]  ;;  %v623_v60 = vld [vmem:[#allocation10 + $0x30] sm:$0xff]  ;;  %v616_v61 = vld [vmem:[#allocation8 + $0x38] sm:$0xff] }
  0xc8   : > { %1257 = vmatmul.mubr.msk.f32.gmra.mrb[2].mxu1 %vm372_vm0, %v365_v9  ;;  %1243 = vmatprep.mubr.msk.f32.mxu0 %vm372_vm0, %v366_v10  ;;  %v624_v62 = vld [vmem:[#allocation10 + $0x38] sm:$0xff]  ;;  %p1669_p8 = pnand %p1668_p9, %p1662_p11 }
  0xc9   : > { %1259 = vmatprep.mubr.msk.f32.mxu1 %vm372_vm0, %v366_v10 }
  0xca   : > { %919 = vperm.xlu1 %1488, %v889_v21  }
  0xcb   : > { %1244 = vmatmul.mubr.msk.f32.gmra.mrb[4].mxu0 %vm372_vm0, %v367_v11  ;;  %914 = vperm.xlu0 %1487, %v888_v22  }
  0xcc   : > { %1260 = vmatmul.mubr.msk.f32.gmra.mrb[4].mxu1 %vm372_vm0, %v367_v11  ;;  %1246 = vmatprep.mubr.msk.f32.mxu0 %vm372_vm0, %v368_v12 }
  0xcd   : > { %1262 = vmatprep.mubr.msk.f32.mxu1 %vm372_vm0, %v368_v12 }
  0xce   : > { %929 = vperm.xlu1 %1488, %v891_v23  }
  0xcf   : > { %1247 = vmatmul.mubr.msk.f32.gmra.mrb[6].mxu0 %vm372_vm0, %v369_v13  ;;  %924 = vperm.xlu0 %1487, %v890_v24  }
  0xd0   : > { %1263 = vmatmul.mubr.msk.f32.gmra.mrb[6].mxu1 %vm372_vm0, %v369_v13  ;;  %1309 = vmatprep.mubr.msk.f32.mxu0 %vm625_vm1, %v609_v15 }
  0xd1   : > { %1281 = vmatprep.mubr.msk.f32.mxu1 %vm625_vm1, %v617_v14 }
 0x141   : > { %v905_v63 = vpop.permute.xlu1 %904 }
 0x142   : > { %v895_v0 = vpop.permute.xlu0 %894 }
 0x145   : > { %v910_v4 = vpop.permute.xlu1 %909 }
 0x146   : > { %v900_v7 = vpop.permute.xlu0 %899 }
 0x149   : > { %v920_v19 = vpop.permute.xlu1 %919 }
 0x196   : > { %v1239_v25 = vpop.f32.mrb[0].mxu0 }
 0x197   : > { %v1255_v26 = vpop.f32.mrb[0].mxu1  ;;  %v463_v27 = vpop.f32.mrb[1].mxu0 }
 0x198   : > { %v1345_v28 = vpack.c.bf16 %v1239_v25, %v463_v27  ;;  %v570_v29 = vpop.f32.mrb[1].mxu1  ;;  %v915_v27 = vpop.permute.xlu0 %914 }
 0x199   : > { %v1329_v30 = vpack.c.bf16 %v1255_v26, %v570_v29 }
 0x19a   : > { %v1242_v31 = vpop.f32.mrb[2].mxu0  ;;  %1346 = vmatprep.subr.bf16.mxu0 %v1345_v28 }
 0x19b   : > { %v1258_v32 = vpop.f32.mrb[2].mxu1  ;;  %1330 = vmatprep.subr.bf16.mxu1 %v1329_v30  ;;  %v473_v33 = vpop.f32.mrb[3].mxu0  ;;  %1348 = vmatpush3.bf16.msra.mxu0 %v1345_v28 }
 0x19c   : > { %v1349_v34 = vpack.c.bf16 %v1242_v31, %v473_v33  ;;  %v580_v35 = vpop.f32.mrb[3].mxu1  ;;  %1332 = vmatpush3.bf16.msra.mxu1 %v1329_v30 }
 0x19d   : > { %v1333_v36 = vpack.c.bf16 %v1258_v32, %v580_v35 }
 0x19e   : > { %v1245_v37 = vpop.f32.mrb[4].mxu0  ;;  %1350 = vmatprep.subr.bf16.mxu0 %v1349_v34 }
 0x19f   : > { %v1261_v38 = vpop.f32.mrb[4].mxu1  ;;  %1334 = vmatprep.subr.bf16.mxu1 %v1333_v36  ;;  %v483_v39 = vpop.f32.mrb[5].mxu0  ;;  %1352 = vmatpush3.bf16.msra.mxu0 %v1349_v34 }
 0x1a0   : > { %v1353_v40 = vpack.c.bf16 %v1245_v37, %v483_v39  ;;  %v590_v41 = vpop.f32.mrb[5].mxu1  ;;  %1336 = vmatpush3.bf16.msra.mxu1 %v1333_v36 }
 0x1a1   : > { %v1337_v42 = vpack.c.bf16 %v1261_v38, %v590_v41 }
 0x1a2   : > { %v1248_v43 = vpop.f32.mrb[6].mxu0  ;;  %1354 = vmatprep.subr.bf16.mxu0 %v1353_v40 }
 0x1a3   : > { %v1264_v44 = vpop.f32.mrb[6].mxu1  ;;  %1338 = vmatprep.subr.bf16.mxu1 %v1337_v42  ;;  %v493_v45 = vpop.f32.mrb[7].mxu0  ;;  %1356 = vmatpush3.bf16.msra.mxu0 %v1353_v40 }
 0x1a4   : > { %v1357_v46 = vpack.c.bf16 %v1248_v43, %v493_v45  ;;  %v600_v47 = vpop.f32.mrb[7].mxu1  ;;  %1340 = vmatpush3.bf16.msra.mxu1 %v1337_v42  ;;  %v930_v43 = vpop.permute.xlu1 %929 }
 0x1a5   : > { %v1341_v48 = vpack.c.bf16 %v1264_v44, %v600_v47 }
 0x1a6   : > { %1358 = vmatprep.subr.bf16.mxu0 %v1357_v46 }
 0x1a7   : > { %1342 = vmatprep.subr.bf16.mxu1 %v1341_v48  ;;  %1360 = vmatpush3.bf16.msra.mxu0 %v1357_v46  ;;  %v925_v46 = vpop.permute.xlu0 %924 }
 0x1a8   : > { %1344 = vmatpush3.bf16.msra.mxu1 %v1341_v48 }
 0x1aa   : > { %1310 = vmatmul.mubr.msk.f32.vlgmr.msra.gmra.mrb[8].mxu0 %vm625_vm1, %v610_v49 }
 0x1ab   : > { %1282 = vmatmul.mubr.msk.f32.vlgmr.msra.gmra.mrb[8].mxu1 %vm625_vm1, %v618_v50  ;;  %1312 = vmatprep.mubr.msk.f32.mxu0 %vm625_vm1, %v611_v51 }
 0x1ac   : > { %1284 = vmatprep.mubr.msk.f32.mxu1 %vm625_vm1, %v619_v52 }
 0x1ae   : > { %1313 = vmatmul.mubr.msk.f32.gmra.mrb[10].mxu0 %vm625_vm1, %v612_v53 }
 0x1af   : > { %1285 = vmatmul.mubr.msk.f32.gmra.mrb[10].mxu1 %vm625_vm1, %v620_v54  ;;  %1315 = vmatprep.mubr.msk.f32.mxu0 %vm625_vm1, %v613_v55 }
 0x1b0   : > { %1287 = vmatprep.mubr.msk.f32.mxu1 %vm625_vm1, %v621_v56 }
 0x1b2   : > { %1316 = vmatmul.mubr.msk.f32.gmra.mrb[12].mxu0 %vm625_vm1, %v614_v57 }
 0x1b3   : > { %1288 = vmatmul.mubr.msk.f32.gmra.mrb[12].mxu1 %vm625_vm1, %v622_v58  ;;  %1318 = vmatprep.mubr.msk.f32.mxu0 %vm625_vm1, %v615_v59 }
 0x1b4   : > { %1290 = vmatprep.mubr.msk.f32.mxu1 %vm625_vm1, %v623_v60 }
 0x1b6   : > { %1319 = vmatmul.mubr.msk.f32.gmra.mrb[14].mxu0 %vm625_vm1, %v616_v61 }
 0x1b7   : > { %1291 = vmatmul.mubr.msk.f32.gmra.mrb[14].mxu1 %vm625_vm1, %v624_v62 }
 0x27d   : > { %v1311_v1 = vpop.f32.mrb[8].mxu0 }
 0x27e   : > { %v1283_v2 = vpop.f32.mrb[8].mxu1  ;;  %v845_v3 = vpop.f32.mrb[9].mxu0 }
 0x27f   : > { %v851_v5 = vadd.f32 %v1311_v1, %v1283_v2  ;;  %v716_v6 = vpop.f32.mrb[9].mxu1 }
 0x280   : > { %v846_v8 = vadd.f32 %v845_v3, %v716_v6 }
 0x281   : > { %v933_v9 = vadd.f32 %v900_v7, %v851_v5  ;;  %v1314_v10 = vpop.f32.mrb[10].mxu0 }
 0x282   : > { %v932_v11 = vadd.f32 %v895_v0, %v846_v8  ;;  %v1286_v12 = vpop.f32.mrb[10].mxu1  ;;  %v855_v13 = vpop.f32.mrb[11].mxu0 }
 0x283   : > { %vm941_vm2 = vcmp.ge.f32.partialorder %v933_v9, 0.0  ;;  %v949_v14 = vmul.f32 0.1, %v933_v9  ;;  %v861_v15 = vadd.f32 %v1314_v10, %v1286_v12  ;;  %v726_v16 = vpop.f32.mrb[11].mxu1 }
 0x284   : > { %vm940_vm4 = vcmp.ge.f32.partialorder %v932_v11, 0.0  ;;  %v948_v17 = vmul.f32 0.1, %v932_v11  ;;  %v856_v18 = vadd.f32 %v855_v13, %v726_v16 }
 0x285   : > { %v957_v20 = vsel %vm941_vm2, %v933_v9, %v949_v14  ;;  %v935_v21 = vadd.f32 %v910_v4, %v861_v15  ;;  %v1317_v22 = vpop.f32.mrb[12].mxu0 }
 0x286   : > { %966 = vst.msk [vmem:[%s2133_s28 + $0x8] sm:$0xff] %vm964_vm3, %v957_v20  ;;  %v956_v23 = vsel %vm940_vm4, %v932_v11, %v948_v17  ;;  %v934_v24 = vadd.f32 %v905_v63, %v856_v18  ;;  %v1289_v25 = vpop.f32.mrb[12].mxu1  ;;  %v865_v26 = vpop.f32.mrb[13].mxu0 }
 0x287   : > { %965 = vst.msk [vmem:[%s2133_s28] sm:$0xff] %vm964_vm3, %v956_v23  ;;  %vm943_vm5 = vcmp.ge.f32.partialorder %v935_v21, 0.0  ;;  %v951_v28 = vmul.f32 0.1, %v935_v21  ;;  %v871_v29 = vadd.f32 %v1317_v22, %v1289_v25  ;;  %v736_v30 = vpop.f32.mrb[13].mxu1 }
 0x288   : > { %vm942_vm6 = vcmp.ge.f32.partialorder %v934_v24, 0.0  ;;  %v950_v31 = vmul.f32 0.1, %v934_v24  ;;  %v866_v32 = vadd.f32 %v865_v26, %v736_v30 }
 0x289   : > { %v959_v33 = vsel %vm943_vm5, %v935_v21, %v951_v28  ;;  %v937_v34 = vadd.f32 %v920_v19, %v871_v29  ;;  %v1320_v35 = vpop.f32.mrb[14].mxu0 }
 0x28a   : > { %968 = vst.msk [vmem:[%s2133_s28 + $0x18] sm:$0xff] %vm964_vm3, %v959_v33  ;;  %v958_v36 = vsel %vm942_vm6, %v934_v24, %v950_v31  ;;  %v936_v37 = vadd.f32 %v915_v27, %v866_v32  ;;  %v1292_v38 = vpop.f32.mrb[14].mxu1  ;;  %v875_v39 = vpop.f32.mrb[15].mxu0 }
 0x28b   : > { %967 = vst.msk [vmem:[%s2133_s28 + $0x10] sm:$0xff] %vm964_vm3, %v958_v36  ;;  %vm945_vm7 = vcmp.ge.f32.partialorder %v937_v34, 0.0  ;;  %v953_v40 = vmul.f32 0.1, %v937_v34  ;;  %v881_v41 = vadd.f32 %v1320_v35, %v1292_v38  ;;  %v746_v42 = vpop.f32.mrb[15].mxu1 }
 0x28c   : > { %vm944_vm8 = vcmp.ge.f32.partialorder %v936_v37, 0.0  ;;  %v952_v44 = vmul.f32 0.1, %v936_v37  ;;  %v876_v45 = vadd.f32 %v875_v39, %v746_v42 }
 0x28d   : > { %v961_v47 = vsel %vm945_vm7, %v937_v34, %v953_v40  ;;  %v939_v48 = vadd.f32 %v930_v43, %v881_v41 }
 0x28e   : > { %970 = vst.msk [vmem:[%s2133_s28 + $0x28] sm:$0xff] %vm964_vm3, %v961_v47  ;;  %v960_v49 = vsel %vm944_vm8, %v936_v37, %v952_v44  ;;  %v938_v50 = vadd.f32 %v925_v46, %v876_v45 }
 0x28f   : > { %969 = vst.msk [vmem:[%s2133_s28 + $0x20] sm:$0xff] %vm964_vm3, %v960_v49  ;;  %vm947_vm9 = vcmp.ge.f32.partialorder %v939_v48, 0.0  ;;  %v955_v51 = vmul.f32 0.1, %v939_v48 }
 0x290   : > { %vm946_vm10 = vcmp.ge.f32.partialorder %v938_v50, 0.0  ;;  %v954_v52 = vmul.f32 0.1, %v938_v50 }
 0x291   : > { %v963_v53 = vsel %vm947_vm9, %v939_v48, %v955_v51 }
 0x292   : > { %972 = vst.msk [vmem:[%s2133_s28 + $0x38] sm:$0xff] %vm964_vm3, %v963_v53  ;;  %v962_v54 = vsel %vm946_vm10, %v938_v50, %v954_v52 }
 0x293   : > { %971 = vst.msk [vmem:[%s2133_s28 + $0x30] sm:$0xff] %vm964_vm3, %v962_v54 }
 0x294   : > { %1672 = shalt.err (!%p1669_p8)
}
 0x295   : > { %s1673_s14 = scalar_lea.hbm %s2152_s15, 1024  ;;  %s1677_s1 = scalar_lea.hbm %s2213_s6, 2048 }
 0x296   : > { %p1674_p3 = scmp.ne.s32.totalorder %s2152_s15, %s1673_s14  ;;  %p1678_p0 = scmp.lt.u32.totalorder %s2152_s15, %s2213_s6 }
 0x297   : > { %p1679_p1 = scmp.lt.u32.totalorder %s1677_s1, %s1673_s14  ;;  %p1681_p6 = scmp.lt.u32.totalorder %s1673_s14, %s2152_s15 }
 0x298   : > { %p1675_p12 = pnand %p1674_p3, %p2236_p5 }
 0x299   : > { %p1680_p7 = por %p1679_p1, %p1678_p0 }
 0x29a   : > { %p1676_p13 = pneg %p1675_p12 }
 0x29b   : > { %p1682_p10 = por %p1681_p6, %p1680_p7 }
 0x29d   : > { %p1683_p11 = pnand %p1682_p10, %p1676_p13 }
 0x29f   : > { %1686 = shalt.err (!%p1683_p11)
}
 0x2a0   : > { %s1765_s11 = smov 128   ;;  %s1766_s16 = smov 8  }
 0x2a1   : > { %1391 = dma.vmem_to_hbm [thread:$0]  (%p2236_p5), %s2154_s9, 1024, %s2152_s15, %s974_s24, %s1765_s11, %s1765_s11, %s1766_s16  }
 0x2a2 PF: > { %s1003_s13 = sand.u32 1, %s1733_s21   ;;  %p2237_p2 = scmp.ne.s32.totalorder %s2231_s20, 0 }
 0x2a3   : > { %p2238_p4 = scmp.ge.s32.totalorder %s1753_s26, 2  ;;  %s1004_s7 = scalar_lea.sflag [#allocation4], %s1003_s13 }
 0x2a5   : > { %p1414_p9 = pnand %p2238_p4, %p2237_p2 }
 0x2a7   : > { %1728 = dma.done.wait (!%p1414_p9), %s1004_s7, 1024  }
 0x2a8   : > { %1730 = vsyncadd (!%p1414_p9), %s1004_s7, 4294966272  ;;  %s25_s26 = sadd.s32 1, %s1753_s26   ;;  %s2239_s21 = smov %s1737_s22 }
 0x2a9   : > { %p22_p8 = scmp.ge.s32.totalorder %s25_s26, 4   ;;  %s2240_s22 = smov %s1741_s23 }
 0x2aa   : > { %s2241_s23 = smov %s2012_s19  ;;  %s2242_s24 = smov %s1749_s25 }
 0x2ab   : > { %s2243_s25 = smov %s2245_s18  ;;  %24 = sbr.rel (!%p22_p8) target bundleno = 11 (0xb), region = 109 }
 0x2b2   :  { %1009 = vsyncpa [#allocation3], 1 }
 0x2b3   :  { %1011 = vsyncpa [#allocation3 + $0x1], 1 }
 0x2b4   :  { %1012 = vsyncpa [#allocation6], 1 }
 0x2b5   :  { %1013 = vsyncpa [#allocation9], 1 }
 0x2b6   :  { %1014 = vsyncpa [#allocation12], 1 }
 0x2b7   :  { %1015 = vsyncpa [#allocation4], 1 }
 0x2b8   :  { %1017 = vsyncpa [#allocation4 + $0x1], 1 }

</bundles_post_ra>
